<compile_context>
chip_gen: v7x
topology: tpu7x:2x2x1
jax: 0.10.0
libtpu: 0.0.40
codegen_flags: <defaults>
</compile_context>

<pallas_src>
import functools

import jax
import jax.numpy as jnp
from jax.experimental import pallas as pl
from jax.experimental.pallas import tpu as pltpu

LANES = 128      # fused hidden / fused output lane width
CRIT_OFF = 64    # critic half of the fused [actor | critic] hidden starts here
MAX_BB = 1024    # max batch rows per grid block


def _round_up(x, m):
    return (x + m - 1) // m * m


def _device_kind():
    try:
        return jax.devices()[0].device_kind.lower()
    except Exception:
        return ""


# --------------------------------------------------------------------------
# Kernel
# --------------------------------------------------------------------------
def _ac_kernel(x_ref, w1_ref, w_ref, b_ref, m_ref, out_ref, *, use_bf16_act):
    """Fused actor+critic forward on one (bb, SDP) batch tile.

    x_ref  : (bb, SDP)    f32   state (lane-padded only to the packed K dim)
    w1_ref : (SDP, 128)   bf16  layer-1 fused [actor | critic] weight (resident)
    w_ref  : (3, 128, 128) bf16 layers 2-3 (block-diag) + fused heads (resident)
    b_ref  : (4, 128)     f32   fused biases (resident)
    m_ref  : (2, 128)     f32   column masks [is_dis ; is_con] (resident)
    out_ref: (bb, 128)    f32   [softmax(dis) | tanh(con) | critic | zeros]
    """
    f32 = jnp.float32
    bf16 = jnp.bfloat16
    act_dtype = bf16 if use_bf16_act else f32

    bias = b_ref[...]                 # (4, 128) f32
    masks = m_ref[...]                # (2, 128) f32
    m_dis = masks[0:1, :]             # (1, 128)
    m_con = masks[1:2, :]             # (1, 128)

    # Layer 1: K = SDP matmul against the small fused [actor | critic] weight.
    x = x_ref[...].astype(bf16)
    h = jnp.dot(x, w1_ref[...], preferred_element_type=f32) + bias[0:1, :]
    h = jnp.tanh(h.astype(act_dtype))

    # Layers 2-3: block-diagonal [actor | critic] (128,128) matmuls + tanh.
    for i in range(2):
        a = jnp.dot(h.astype(bf16), w_ref[i],
                    preferred_element_type=f32) + bias[i + 1:i + 2, :]
        h = jnp.tanh(a.astype(act_dtype))

    # Fused heads: one matmul -> [dis-logits | con-pre-tanh | critic | 0-pad].
    y = jnp.dot(h.astype(bf16), w_ref[2],
                preferred_element_type=f32) + bias[3:4, :]

    # Masked softmax over the dis columns only (exact normalization so
    # downstream Categorical sampling sees rows that sum to 1).
    logits = y * m_dis + (m_dis - 1.0) * 1e30        # non-dis columns -> -1e30
    mx = jnp.max(logits, axis=-1, keepdims=True)
    e = jnp.exp(logits - mx)                         # non-dis columns underflow to 0
    dis = e / jnp.sum(e, axis=-1, keepdims=True)

    con = jnp.tanh(y)
    out = dis + con * m_con + y * (1.0 - m_dis - m_con)
    out_ref[...] = out.astype(out_ref.dtype)


# --------------------------------------------------------------------------
# One-time parameter packing (do this OUTSIDE the per-step hot path)
# --------------------------------------------------------------------------
def pack_params(p, state_dim, action_dim, mid_dim):
    """Pack all weights/biases into: w1 (SDP,128) bf16, w_stack (3,128,128) bf16,
    b_stack (4,128) f32, and the (2,128) f32 column masks.

    Fused hidden layout: actor features in lanes [0, m_i), critic features in
    lanes [64, 64+m_i). Head output layout: [dis (A) | con (A) | crit (1) | 0].
    """
    m0, m1, m2 = mid_dim
    A = action_dim
    assert max(m0, m1, m2) <= CRIT_OFF, "mid_dim entries must be <= 64"
    assert 2 * A + 1 <= LANES, "action_dim too large for one fused 128-lane tile"
    f32 = jnp.float32
    sdp = _round_up(max(state_dim, 1), 16)   # bf16 sublane-tile aligned K dim

    # Layer 1 (state -> fused hidden): actor and critic side by side.
    w1 = jnp.zeros((sdp, LANES), f32)
    w1 = w1.at[:state_dim, :m0].set(p["sw1"])
    w1 = w1.at[:state_dim, CRIT_OFF:CRIT_OFF + m0].set(p["cw1"])
    b1 = jnp.zeros((LANES,), f32)
    b1 = b1.at[:m0].set(p["sb1"][0]).at[CRIT_OFF:CRIT_OFF + m0].set(p["cb1"][0])

    def blockdiag(wa, wc, din, dout):
        w = jnp.zeros((LANES, LANES), f32)
        w = w.at[:din, :dout].set(wa)
        w = w.at[CRIT_OFF:CRIT_OFF + din, CRIT_OFF:CRIT_OFF + dout].set(wc)
        return w

    # Layers 2-3: block-diagonal (no actor<->critic mixing).
    w2 = blockdiag(p["sw2"], p["cw2"], m0, m1)
    b2 = jnp.zeros((LANES,), f32)
    b2 = b2.at[:m1].set(p["sb2"][0]).at[CRIT_OFF:CRIT_OFF + m1].set(p["cb2"][0])

    w3 = blockdiag(p["sw3"], p["cw3"], m1, m2)
    b3 = jnp.zeros((LANES,), f32)
    b3 = b3.at[:m2].set(p["sb3"][0]).at[CRIT_OFF:CRIT_OFF + m2].set(p["cb3"][0])

    # Fused heads: [wd | wc | cw4 | 0] over the fused hidden.
    wh = jnp.zeros((LANES, LANES), f32)
    wh = wh.at[:m2, :A].set(p["wd"])
    wh = wh.at[:m2, A:2 * A].set(p["wc"])
    wh = wh.at[CRIT_OFF:CRIT_OFF + m2, 2 * A:2 * A + 1].set(p["cw4"])
    bh = jnp.zeros((LANES,), f32)
    bh = bh.at[:A].set(p["bd"][0]).at[A:2 * A].set(p["bc"][0])
    bh = bh.at[2 * A].set(p["cb4"][0, 0])

    w1_packed = w1.astype(jnp.bfloat16)                           # (SDP,128)
    w_stack = jnp.stack([w2, w3, wh]).astype(jnp.bfloat16)        # (3,128,128)
    b_stack = jnp.stack([b1, b2, b3, bh])                         # (4,128) f32

    col = jnp.arange(LANES)
    masks = jnp.stack([(col < A).astype(f32),
                       ((col >= A) & (col < 2 * A)).astype(f32)])  # (2,128)
    return w1_packed, w_stack, b_stack, masks


# --------------------------------------------------------------------------
# Wrapper (jitted)
# --------------------------------------------------------------------------
@functools.partial(jax.jit,
                   static_argnames=("action_dim", "use_bf16_act", "multi_tc"))
def _forward_jit(state, w1, w_stack, b_stack, masks, *,
                 action_dim, use_bf16_act, multi_tc):
    batch, state_dim = state.shape
    sdp = w1.shape[0]
    A = action_dim

    # Lane-pad state only up to the small packed layer-1 K dim (no 128 pad).
    if state_dim < sdp:
        state = jnp.pad(state, ((0, 0), (0, sdp - state_dim)))

    # Batch blocking: big blocks to amortize the ~0.35us/grid-step overhead;
    # on v7x keep >=2 blocks once batch >= 16 so both TensorCores get work.
    pb8 = _round_up(batch, 8)
    bb = min(MAX_BB, pb8)
    if multi_tc and pb8 >= 16:
        bb = min(bb, _round_up((pb8 + 1) // 2, 8))
    padded_batch = _round_up(pb8, bb)
    if padded_batch != batch:
        state = jnp.pad(state, ((0, padded_batch - batch), (0, 0)))

    kernel = functools.partial(_ac_kernel, use_bf16_act=use_bf16_act)
    resident = pl.BlockSpec(memory_space=pltpu.MemorySpace.VMEM)  # non-pipelined
    out = pl.pallas_call(
        kernel,
        out_shape=jax.ShapeDtypeStruct((padded_batch, LANES), jnp.float32),
        grid=(padded_batch // bb,),
        in_specs=[
            pl.BlockSpec((bb, sdp), lambda i: (i, 0)),   # pipelined state tiles
            resident,    # w1      (SDP,128)  bf16
            resident,    # w_stack (3,128,128) bf16
            resident,    # b_stack (4,128)    f32
            resident,    # masks   (2,128)    f32
        ],
        out_specs=pl.BlockSpec((bb, LANES), lambda i: (i, 0)),
        compiler_params=pltpu.CompilerParams(
            dimension_semantics=("parallel",)),
    )(state, w1, w_stack, b_stack, masks)

    dis = out[:batch, :A]
    con = out[:batch, A:2 * A]
    crit = out[:batch, 2 * A:2 * A + 1]
    return dis, con, crit


def actor_critic_forward(state, w1, w_stack, b_stack, masks, action_dim):
    kind = _device_kind()
    use_bf16_act = ("v6" in kind) or ("v7" in kind)   # v5e EUP/VPU lack bf16
    multi_tc = "v7" in kind                           # 2 TensorCores per chip
    return _forward_jit(state, w1, w_stack, b_stack, masks,
                        action_dim=action_dim,
                        use_bf16_act=use_bf16_act,
                        multi_tc=multi_tc)


# --------------------------------------------------------------------------
# Synthetic init + references
# --------------------------------------------------------------------------
def init_params(key, state_dim, action_dim, mid_dim):
    """Deterministic synthetic init (same shapes as the PyTorch module)."""
    keys = jax.random.split(key, 18)

    def w(k, din, dout):
        scale = 1.0 / jnp.sqrt(jnp.float32(din))
        return jax.random.uniform(k, (din, dout), jnp.float32, -1.0, 1.0) * scale

    def b(k, dout, din):
        scale = 1.0 / jnp.sqrt(jnp.float32(din))
        return jax.random.uniform(k, (1, dout), jnp.float32, -1.0, 1.0) * scale

    m0, m1, m2 = mid_dim
    p = {}
    p["sw1"], p["sb1"] = w(keys[0], state_dim, m0), b(keys[1], m0, state_dim)
    p["sw2"], p["sb2"] = w(keys[2], m0, m1),        b(keys[3], m1, m0)
    p["sw3"], p["sb3"] = w(keys[4], m1, m2),        b(keys[5], m2, m1)
    p["wd"], p["bd"] = w(keys[6], m2, action_dim),  b(keys[7], action_dim, m2)
    p["wc"], p["bc"] = w(keys[8], m2, action_dim),  b(keys[9], action_dim, m2)
    p["cw1"], p["cb1"] = w(keys[10], state_dim, m0), b(keys[11], m0, state_dim)
    p["cw2"], p["cb2"] = w(keys[12], m0, m1),        b(keys[13], m1, m0)
    p["cw3"], p["cb3"] = w(keys[14], m1, m2),        b(keys[15], m2, m1)
    p["cw4"], p["cb4"] = w(keys[16], m2, 1),         b(keys[17], 1, m2)
    # TODO(synk): log_std exists in the module but is unused by forward();
    # act()/get_logprob_entropy() sampling paths are out of scope for this kernel.
    p["log_std"] = jnp.zeros((action_dim,), jnp.float32) + (-0.5)
    return p


def reference_forward(state, p):
    """Pure-JAX f32 reference mirroring the PyTorch forward()."""
    h = jnp.tanh(state @ p["sw1"] + p["sb1"])
    h = jnp.tanh(h @ p["sw2"] + p["sb2"])
    h = jnp.tanh(h @ p["sw3"] + p["sb3"])
    dis = jax.nn.softmax(h @ p["wd"] + p["bd"], axis=-1)
    con = jnp.tanh(h @ p["wc"] + p["bc"])
    c = jnp.tanh(state @ p["cw1"] + p["cb1"])
    c = jnp.tanh(c @ p["cw2"] + p["cb2"])
    c = jnp.tanh(c @ p["cw3"] + p["cb3"])
    crit = c @ p["cw4"] + p["cb4"]
    return dis, con, crit


def reference_forward_matched(state, p, use_bf16_act):
    """Reference with the same bf16-MXU / activation-dtype numerics as the kernel."""
    bf = jnp.bfloat16
    act = bf if use_bf16_act else jnp.float32

    def lin(x, w, b):
        return jnp.dot(x.astype(bf), w.astype(bf),
                       preferred_element_type=jnp.float32) + b

    def tl(x, w, b):
        return jnp.tanh(lin(x, w, b).astype(act)).astype(jnp.float32)

    h = tl(state, p["sw1"], p["sb1"])
    h = tl(h, p["sw2"], p["sb2"])
    h = tl(h, p["sw3"], p["sb3"])
    dis = jax.nn.softmax(lin(h, p["wd"], p["bd"]), axis=-1)
    con = jnp.tanh(lin(h, p["wc"], p["bc"]))
    c = tl(state, p["cw1"], p["cb1"])
    c = tl(c, p["cw2"], p["cb2"])
    c = tl(c, p["cw3"], p["cb3"])
    crit = lin(c, p["cw4"], p["cb4"])
    return dis, con, crit


# --------------------------------------------------------------------------
# Demo / self-test
# --------------------------------------------------------------------------
if __name__ == "__main__":
    batch = 8
    state_dim = 16
    action_dim = 8
    mid_dim = (32, 32, 32)

    key = jax.random.PRNGKey(0)
    k_state, k_params = jax.random.split(key)
    state = jax.random.normal(k_state, (batch, state_dim), jnp.float32)
    params = init_params(k_params, state_dim, action_dim, mid_dim)

    # One-time packing (outside the per-step hot path).
    w1, w_stack, b_stack, masks = pack_params(params, state_dim, action_dim, mid_dim)

    dis, con, crit = jax.block_until_ready(
        actor_critic_forward(state, w1, w_stack, b_stack, masks, action_dim))

    assert dis.shape == (batch, action_dim)
    assert con.shape == (batch, action_dim)
    assert crit.shape == (batch, 1)

    # Tight check vs a reference using the same matmul/activation numerics.
    kind = _device_kind()
    use_bf16_act = ("v6" in kind) or ("v7" in kind)
    tol = 2e-2 if use_bf16_act else 5e-3
    m_dis, m_con, m_crit = reference_forward_matched(state, params, use_bf16_act)
    assert jnp.allclose(dis, m_dis, atol=tol), "dis mismatch (matched ref)"
    assert jnp.allclose(con, m_con, atol=tol), "con mismatch (matched ref)"
    assert jnp.allclose(crit, m_crit, atol=tol), "crit mismatch (matched ref)"

    # Looser semantic check vs the pure-f32 PyTorch-equivalent reference
    # (bf16 MXU operands introduce ~1e-2 level quantization error).
    r_dis, r_con, r_crit = reference_forward(state, params)
    assert jnp.allclose(dis, r_dis, atol=1.5e-1), "dis mismatch (f32 ref)"
    assert jnp.allclose(con, r_con, atol=1.5e-1), "con mismatch (f32 ref)"
    assert jnp.allclose(crit, r_crit, atol=1.5e-1), "crit mismatch (f32 ref)"
    # exact-divide softmax rows sum to ~1
    assert jnp.allclose(jnp.sum(dis, axis=-1), 1.0, atol=1e-3)

    print("KERNEL_OK")
</pallas_src>

<mosaic_0001>
module attributes {stable_mosaic.version = 11 : i64} {
  func.func @_ac_kernel(%arg0: i32, %arg1: memref<8x16xf32, #tpu.memory_space<vmem>>, %arg2: memref<16x128xbf16, #tpu.memory_space<vmem>>, %arg3: memref<3x128x128xbf16, #tpu.memory_space<vmem>>, %arg4: memref<4x128xf32, #tpu.memory_space<vmem>>, %arg5: memref<2x128xf32, #tpu.memory_space<vmem>>, %arg6: memref<8x128xf32, #tpu.memory_space<vmem>>) attributes {dimension_semantics = [#tpu.dimension_semantics<parallel>], iteration_bounds = array<i64: 1>, scalar_prefetch = 0 : i64, scratch_operands = 0 : i64, tpu.core_type = #tpu.core_type<tc>, window_params = [{transform_indices = @transform_0, window_bounds = array<i64: 8, 16>}, {pipeline_mode = #tpu.pipeline_mode<synchronous>, transform_indices = @transform_1, window_bounds = array<i64: 16, 128>}, {pipeline_mode = #tpu.pipeline_mode<synchronous>, transform_indices = @transform_2, window_bounds = array<i64: 3, 128, 128>}, {pipeline_mode = #tpu.pipeline_mode<synchronous>, transform_indices = @transform_3, window_bounds = array<i64: 4, 128>}, {pipeline_mode = #tpu.pipeline_mode<synchronous>, transform_indices = @transform_4, window_bounds = array<i64: 2, 128>}, {transform_indices = @transform_5, window_bounds = array<i64: 8, 128>}]} {
    %c0 = arith.constant 0 : index
    %c0_0 = arith.constant 0 : index
    %0 = vector.load %arg4[%c0, %c0_0] : memref<4x128xf32, #tpu.memory_space<vmem>>, vector<4x128xf32>
    %c0_1 = arith.constant 0 : index
    %c0_2 = arith.constant 0 : index
    %1 = vector.load %arg5[%c0_1, %c0_2] : memref<2x128xf32, #tpu.memory_space<vmem>>, vector<2x128xf32>
    %2 = vector.extract_strided_slice %1 {offsets = [0, 0], sizes = [1, 128], strides = [1, 1]} : vector<2x128xf32> to vector<1x128xf32>
    %3 = vector.extract_strided_slice %1 {offsets = [1, 0], sizes = [1, 128], strides = [1, 1]} : vector<2x128xf32> to vector<1x128xf32>
    %c0_3 = arith.constant 0 : index
    %c0_4 = arith.constant 0 : index
    %4 = vector.load %arg1[%c0_3, %c0_4] : memref<8x16xf32, #tpu.memory_space<vmem>>, vector<8x16xf32>
    %5 = arith.truncf %4 : vector<8x16xf32> to vector<8x16xbf16>
    %c0_5 = arith.constant 0 : index
    %c0_6 = arith.constant 0 : index
    %6 = vector.load %arg2[%c0_5, %c0_6] : memref<16x128xbf16, #tpu.memory_space<vmem>>, vector<16x128xbf16>
    %cst = arith.constant dense<0.000000e+00> : vector<8x128xf32>
    %7 = tpu.matmul %5, %6, %cst {dimension_numbers = #tpu.dot_dimension_numbers<[1], [0], [0], [1], [0, 0, 1, 1], [], []>} : vector<8x16xbf16>, vector<16x128xbf16>, vector<8x128xf32> -> vector<8x128xf32>
    %8 = vector.extract_strided_slice %0 {offsets = [0, 0], sizes = [1, 128], strides = [1, 1]} : vector<4x128xf32> to vector<1x128xf32>
    %9 = vector.broadcast %8 : vector<1x128xf32> to vector<8x128xf32>
    %10 = arith.addf %7, %9 : vector<8x128xf32>
    %11 = math.tanh %10 : vector<8x128xf32>
    %12 = arith.truncf %11 : vector<8x128xf32> to vector<8x128xbf16>
    %c0_7 = arith.constant 0 : index
    %c0_8 = arith.constant 0 : index
    %c0_9 = arith.constant 0 : index
    %13 = vector.load %arg3[%c0_7, %c0_8, %c0_9] : memref<3x128x128xbf16, #tpu.memory_space<vmem>>, vector<1x128x128xbf16>
    %14 = vector.shape_cast %13 : vector<1x128x128xbf16> to vector<128x128xbf16>
    %cst_10 = arith.constant dense<0.000000e+00> : vector<8x128xf32>
    %15 = tpu.matmul %12, %14, %cst_10 {dimension_numbers = #tpu.dot_dimension_numbers<[1], [0], [0], [1], [0, 0, 1, 1], [], []>} : vector<8x128xbf16>, vector<128x128xbf16>, vector<8x128xf32> -> vector<8x128xf32>
    %16 = vector.extract_strided_slice %0 {offsets = [1, 0], sizes = [1, 128], strides = [1, 1]} : vector<4x128xf32> to vector<1x128xf32>
    %17 = vector.broadcast %16 : vector<1x128xf32> to vector<8x128xf32>
    %18 = arith.addf %15, %17 : vector<8x128xf32>
    %19 = math.tanh %18 : vector<8x128xf32>
    %20 = arith.truncf %19 : vector<8x128xf32> to vector<8x128xbf16>
    %c1 = arith.constant 1 : index
    %c0_11 = arith.constant 0 : index
    %c0_12 = arith.constant 0 : index
    %21 = vector.load %arg3[%c1, %c0_11, %c0_12] : memref<3x128x128xbf16, #tpu.memory_space<vmem>>, vector<1x128x128xbf16>
    %22 = vector.shape_cast %21 : vector<1x128x128xbf16> to vector<128x128xbf16>
    %cst_13 = arith.constant dense<0.000000e+00> : vector<8x128xf32>
    %23 = tpu.matmul %20, %22, %cst_13 {dimension_numbers = #tpu.dot_dimension_numbers<[1], [0], [0], [1], [0, 0, 1, 1], [], []>} : vector<8x128xbf16>, vector<128x128xbf16>, vector<8x128xf32> -> vector<8x128xf32>
    %24 = vector.extract_strided_slice %0 {offsets = [2, 0], sizes = [1, 128], strides = [1, 1]} : vector<4x128xf32> to vector<1x128xf32>
    %25 = vector.broadcast %24 : vector<1x128xf32> to vector<8x128xf32>
    %26 = arith.addf %23, %25 : vector<8x128xf32>
    %27 = math.tanh %26 : vector<8x128xf32>
    %28 = arith.truncf %27 : vector<8x128xf32> to vector<8x128xbf16>
    %c2 = arith.constant 2 : index
    %c0_14 = arith.constant 0 : index
    %c0_15 = arith.constant 0 : index
    %29 = vector.load %arg3[%c2, %c0_14, %c0_15] : memref<3x128x128xbf16, #tpu.memory_space<vmem>>, vector<1x128x128xbf16>
    %30 = vector.shape_cast %29 : vector<1x128x128xbf16> to vector<128x128xbf16>
    %cst_16 = arith.constant dense<0.000000e+00> : vector<8x128xf32>
    %31 = tpu.matmul %28, %30, %cst_16 {dimension_numbers = #tpu.dot_dimension_numbers<[1], [0], [0], [1], [0, 0, 1, 1], [], []>} : vector<8x128xbf16>, vector<128x128xbf16>, vector<8x128xf32> -> vector<8x128xf32>
    %32 = vector.extract_strided_slice %0 {offsets = [3, 0], sizes = [1, 128], strides = [1, 1]} : vector<4x128xf32> to vector<1x128xf32>
    %33 = vector.broadcast %32 : vector<1x128xf32> to vector<8x128xf32>
    %34 = arith.addf %31, %33 : vector<8x128xf32>
    %35 = vector.broadcast %2 : vector<1x128xf32> to vector<8x128xf32>
    %36 = arith.mulf %34, %35 : vector<8x128xf32>
    %cst_17 = arith.constant 1.000000e+00 : f32
    %37 = vector.broadcast %cst_17 : f32 to vector<1x128xf32>
    %38 = arith.subf %2, %37 : vector<1x128xf32>
    %cst_18 = arith.constant 1.000000e+30 : f32
    %39 = vector.broadcast %cst_18 : f32 to vector<1x128xf32>
    %40 = arith.mulf %38, %39 : vector<1x128xf32>
    %41 = vector.broadcast %40 : vector<1x128xf32> to vector<8x128xf32>
    %42 = arith.addf %36, %41 : vector<8x128xf32>
    %cst_19 = arith.constant dense<0xFF800000> : vector<8xf32>
    %43 = vector.multi_reduction <maximumf>, %42, %cst_19 [1] : vector<8x128xf32> to vector<8xf32>
    %44 = vector.shape_cast %43 : vector<8xf32> to vector<8x1xf32>
    %45 = vector.broadcast %44 : vector<8x1xf32> to vector<8x128xf32>
    %46 = arith.subf %42, %45 : vector<8x128xf32>
    %47 = math.exp %46 : vector<8x128xf32>
    %cst_20 = arith.constant dense<0.000000e+00> : vector<8xf32>
    %48 = vector.multi_reduction <add>, %47, %cst_20 [1] : vector<8x128xf32> to vector<8xf32>
    %49 = vector.shape_cast %48 : vector<8xf32> to vector<8x1xf32>
    %50 = vector.broadcast %49 : vector<8x1xf32> to vector<8x128xf32>
    %51 = arith.divf %47, %50 : vector<8x128xf32>
    %52 = math.tanh %34 : vector<8x128xf32>
    %53 = vector.broadcast %3 : vector<1x128xf32> to vector<8x128xf32>
    %54 = arith.mulf %52, %53 : vector<8x128xf32>
    %55 = arith.addf %51, %54 : vector<8x128xf32>
    %cst_21 = arith.constant 1.000000e+00 : f32
    %56 = vector.broadcast %cst_21 : f32 to vector<1x128xf32>
    %57 = arith.subf %56, %2 : vector<1x128xf32>
    %58 = arith.subf %57, %3 : vector<1x128xf32>
    %59 = vector.broadcast %58 : vector<1x128xf32> to vector<8x128xf32>
    %60 = arith.mulf %34, %59 : vector<8x128xf32>
    %61 = arith.addf %55, %60 : vector<8x128xf32>
    %c0_22 = arith.constant 0 : index
    %c0_23 = arith.constant 0 : index
    %62 = vector.load %arg6[%c0_22, %c0_23] : memref<8x128xf32, #tpu.memory_space<vmem>>, vector<8x128xf32>
    tpu.vector_store %arg6[%c0_22, %c0_23], %61 {strides = array<i32>} : memref<8x128xf32, #tpu.memory_space<vmem>>, vector<8x128xf32>,
    return
  }
  func.func @transform_0(%arg0: i32) -> (i32, i32) {
    %c0_i32 = arith.constant 0 : i32
    %c0_i32_0 = arith.constant 0 : i32
    return %arg0, %c0_i32 : i32, i32
  }
  func.func @transform_1(%arg0: i32) -> (i32, i32) {
    %c0_i32 = arith.constant 0 : i32
    %c0_i32_0 = arith.constant 0 : i32
    %c0_i32_1 = arith.constant 0 : i32
    return %c0_i32, %c0_i32_0 : i32, i32
  }
  func.func @transform_2(%arg0: i32) -> (i32, i32, i32) {
    %c0_i32 = arith.constant 0 : i32
    %c0_i32_0 = arith.constant 0 : i32
    %c0_i32_1 = arith.constant 0 : i32
    %c0_i32_2 = arith.constant 0 : i32
    return %c0_i32, %c0_i32_0, %c0_i32_1 : i32, i32, i32
  }
  func.func @transform_3(%arg0: i32) -> (i32, i32) {
    %c0_i32 = arith.constant 0 : i32
    %c0_i32_0 = arith.constant 0 : i32
    %c0_i32_1 = arith.constant 0 : i32
    return %c0_i32, %c0_i32_0 : i32, i32
  }
  func.func @transform_4(%arg0: i32) -> (i32, i32) {
    %c0_i32 = arith.constant 0 : i32
    %c0_i32_0 = arith.constant 0 : i32
    %c0_i32_1 = arith.constant 0 : i32
    return %c0_i32, %c0_i32_0 : i32, i32
  }
  func.func @transform_5(%arg0: i32) -> (i32, i32) {
    %c0_i32 = arith.constant 0 : i32
    %c0_i32_0 = arith.constant 0 : i32
    return %arg0, %c0_i32 : i32, i32
  }
}

</mosaic_0001>

<bundles_post_ra>
// kernel: _forward_jit.1
= control target key start
LH: loop header
LB: loop body
LE: loop exit
PB: predicated region body
PF: predicated region fallthrough
CT: control target
= control target key end

     0   :  { %10 = vsyncpa [#allocation3], 0  ;;  %s873_s0 = inlined_call_operand.hbm [shape: f32[8,16], index: 0, kind: input, shape index: {}]   ;;  %s874_s1 = inlined_call_operand.hbm [shape: bf16[16,128], index: 1, kind: input, shape index: {}]   ;;  %s875_s2 = inlined_call_operand.hbm [shape: bf16[3,128,128], index: 2, kind: input, shape index: {}]   ;;  %s876_s3 = inlined_call_operand.vmem [shape: f32[4,128], index: 3, kind: input, shape index: {}]   ;;  %s877_s4 = inlined_call_operand.vmem [shape: f32[2,128], index: 4, kind: input, shape index: {}]   ;;  %s878_s5 = inlined_call_operand.vmem [shape: f32[8,128], index: 5, kind: output, shape index: {}]  }
   0x1   :  { %11 = vsyncpa [#allocation5], 0  ;;  %s734_s18 = smov [#allocation4]   ;;  %s664_s22 = scalar_lea.hbm %s874_s1, 128 }
   0x2   :  { %s27_s19 = sshll.u32 %s734_s18, 4  ;;  %p665_p0 = scmp.ne.s32.totalorder %s874_s1, %s664_s22  ;;  %s28_s19 = int_to_ptr.vmem [resolvable:$true] %s27_s19 }
   0x3   :  { %p668_p1 = scmp.lt.u32.totalorder %s664_s22, %s874_s1 }
   0x5   :  { %p670_p2 = pnand %p668_p1, %p665_p0 }
   0x7   :  { %673 = shalt.err (!%p670_p2)
}
   0x8   :  { %s674_s27 = scalar_lea.vmem %s28_s19, 128  ;;  %p679_p4 = scmp.lt.s32.totalorder %s28_s19, %s28_s19 }
   0x9   :  { %p675_p3 = scmp.ne.s32.totalorder %s28_s19, %s674_s27  ;;  %p680_p5 = scmp.lt.s32.totalorder %s674_s27, %s674_s27 }
   0xb   :  { %p681_p6 = por %p680_p5, %p679_p4 }
   0xd   :  { %p682_p7 = pnand %p681_p6, %p675_p3 }
   0xf   :  { %685 = shalt.err (!%p682_p7)
}
  0x10   :  { %s735_s28 = smov 64   ;;  %s736_s29 = smov 4  }
  0x11   :  { %33 = dma.hbm_to_vmem [thread:$0]  %s874_s1, 128, %s28_s19, [#allocation5], %s735_s28, %s735_s28, %s736_s29  }
  0x12   :  { %s737_s7 = smov [#allocation2]   ;;  %s738_s9 = smov [#allocation6]  }
  0x13   :  { %s18_s8 = sshll.u32 %s737_s7, 4  ;;  %s39_s10 = sshll.u32 %s738_s9, 4  ;;  %s19_s8 = int_to_ptr.vmem [resolvable:$true] %s18_s8  ;;  %s40_s10 = int_to_ptr.vmem [resolvable:$true] %s39_s10 }
  0x14   :  { %s686_s13 = scalar_lea.hbm %s873_s0, 128 }
  0x15   :  { %p687_p8 = scmp.ne.s32.totalorder %s873_s0, %s686_s13  ;;  %p690_p9 = scmp.lt.u32.totalorder %s686_s13, %s873_s0 }
  0x17   :  { %p692_p10 = pnand %p690_p9, %p687_p8 }
  0x19   :  { %695 = shalt.err (!%p692_p10)
}
  0x1a   :  { %s696_s1 = scalar_lea.vmem %s19_s8, 128  ;;  %p701_p12 = scmp.lt.s32.totalorder %s19_s8, %s19_s8 }
  0x1b   :  { %p697_p11 = scmp.ne.s32.totalorder %s19_s8, %s696_s1  ;;  %p702_p13 = scmp.lt.s32.totalorder %s696_s1, %s696_s1 }
  0x1d   :  { %p703_p0 = por %p702_p13, %p701_p12 }
  0x1f   :  { %p704_p1 = pnand %p703_p0, %p697_p11 }
  0x21   :  { %707 = shalt.err (!%p704_p1)
}
  0x22   :  { %21 = dma.hbm_to_vmem [thread:$0]  %s873_s0, 128, %s19_s8, [#allocation3]  }
  0x23   :  { %s708_s22 = scalar_lea.hbm %s875_s2, 3072 }
  0x24   :  { %p709_p2 = scmp.ne.s32.totalorder %s875_s2, %s708_s22  ;;  %p712_p3 = scmp.lt.u32.totalorder %s708_s22, %s875_s2 }
  0x26   :  { %p714_p4 = pnand %p712_p3, %p709_p2 }
  0x28   :  { %717 = shalt.err (!%p714_p4)
}
  0x29   :  { %s718_s27 = scalar_lea.vmem %s40_s10, 3072  ;;  %p723_p6 = scmp.lt.s32.totalorder %s40_s10, %s40_s10 }
  0x2a   :  { %p719_p5 = scmp.ne.s32.totalorder %s40_s10, %s718_s27  ;;  %p724_p7 = scmp.lt.s32.totalorder %s718_s27, %s718_s27 }
  0x2c   :  { %p725_p8 = por %p724_p7, %p723_p6 }
  0x2e   :  { %p726_p9 = pnand %p725_p8, %p719_p5 }
  0x30   :  { %729 = shalt.err (!%p726_p9)
}
  0x31   :  { %45 = dma.hbm_to_vmem [thread:$0]  %s875_s2, 3072, %s40_s10, [#allocation5], %s735_s28, %s735_s28, %s736_s29  }
  0x32   :  { %730 = dma.done.wait [#allocation3], 128  }
  0x33   :  { %731 = vsyncadd [#allocation3], 4294967168 }
  0x34   :  { %732 = dma.done.wait [#allocation5], 3200  }
  0x35   :  { %733 = vsyncadd [#allocation5], 4294964096  ;;  %v739_v0 = vmov 0.0   ;;  %vm740_vm0 = vmmov 0   ;;  %v627_v1 = vld [vmem:[#allocation4] sm:$0xff]   ;;  %v62_v2 = vld [vmem:[#allocation2] sm:$0xff]  ;;  %v66_v16 = vlaneseq }
  0x36   :  { %554 = vmatprep.subr.bf16.mxu0 %v739_v0  ;;  %556 = vmatprep.mubr.msk.bf16.mxu0 %vm740_vm0, %v739_v0  ;;  %v63_v3 = vpack.c.bf16 %v62_v2, %v62_v2  ;;  %vm76_vm1 = vcmask 130048   ;;  %v628_v4 = vld [vmem:[#allocation6] sm:$0xff]   ;;  %v629_v5 = vld [vmem:[#allocation6 + $0x8] sm:$0xff]   ;;  %v630_v6 = vld [vmem:[#allocation6 + $0x10] sm:$0xff]  }
  0x37   :  { %560 = vmatprep.subr.bf16.mxu1 %v739_v0  ;;  %576 = vmatprep.mubr.msk.bf16.mxu1 %vm740_vm0, %v739_v0  ;;  %v631_v7 = vld [vmem:[#allocation6 + $0x18] sm:$0xff]   ;;  %v632_v8 = vld [vmem:[#allocation6 + $0x20] sm:$0xff]   ;;  %v633_v9 = vld [vmem:[#allocation6 + $0x28] sm:$0xff]   ;;  %v834_v17 = vshrl.u32 %v66_v16, 7 }
  0x38   :  { %555 = vmatpush3.bf16.msra.mxu0 %v627_v1  ;;  %561 = vmatpush3.bf16.msra.mxu1 %v628_v4  ;;  %v634_v10 = vld [vmem:[#allocation6 + $0x30] sm:$0xff]   ;;  %v635_v11 = vld [vmem:[#allocation6 + $0x38] sm:$0xff]   ;;  %v636_v12 = vld [vmem:[#allocation6 + $0x40] sm:$0xff]  }
  0x39   :  { %580 = vmatprep.subr.bf16.mxu0 %v739_v0  ;;  %562 = vmatprep.subr.bf16.mxu1 %v739_v0  ;;  %v637_v13 = vld [vmem:[#allocation6 + $0x48] sm:$0xff]   ;;  %v638_v14 = vld [vmem:[#allocation6 + $0x50] sm:$0xff]   ;;  %v639_v15 = vld [vmem:[#allocation6 + $0x58] sm:$0xff]   ;;  %v837_v18 = vsub.s32 0, %v834_v17  ;;  %v140_v36 = vsub.s32 1, %v834_v17  ;;  %v251_v49 = vsub.s32 2, %v834_v17 }
  0x3a   :  { %v842_v19 = vld [vmem:[%s876_s3] sm:$0xf]  ;;  %v640_v28 = vld [vmem:[#allocation6 + $0x60] sm:$0xff]   ;;  %v642_v30 = vld [vmem:[#allocation6 + $0x70] sm:$0xff]   ;;  %v362_v59 = vsub.s32 3, %v834_v17 }
  0x3b   :  { %557 = vmatmul.mubr.msk.bf16.vlgmr.msra.gmra.mrb[0].mxu0 %vm76_vm1, %v63_v3  ;;  %v69_v20 = vrot.slane %v842_v19, %v837_v18  ;;  %v641_v29 = vld [vmem:[#allocation6 + $0x68] sm:$0xff]   ;;  %v643_v31 = vld [vmem:[#allocation6 + $0x78] sm:$0xff]   ;;  %v644_v32 = vld [vmem:[#allocation6 + $0x80] sm:$0xff]   ;;  %v141_v37 = vrot.slane %v842_v19, %v140_v36  ;;  %v252_v50 = vrot.slane %v842_v19, %v251_v49 }
  0x3c   :  { %596 = vmatprep.mubr.msk.bf16.mxu0 %vm740_vm0, %v739_v0  ;;  %563 = vmatpush3.bf16.msra.mxu1 %v629_v5  ;;  %v645_v33 = vld [vmem:[#allocation6 + $0x88] sm:$0xff]   ;;  %v646_v34 = vld [vmem:[#allocation6 + $0x90] sm:$0xff]   ;;  %v647_v35 = vld [vmem:[#allocation6 + $0x98] sm:$0xff]   ;;  %v363_v61 = vrot.slane %v842_v19, %v362_v59 }
  0x3d   :  { %564 = vmatprep.subr.bf16.mxu1 %v739_v0  ;;  %581 = vmatpush3.bf16.msra.mxu0 %v636_v12  ;;  %v648_v45 = vld [vmem:[#allocation6 + $0xa0] sm:$0xff]   ;;  %v649_v46 = vld [vmem:[#allocation6 + $0xa8] sm:$0xff]   ;;  %v650_v47 = vld [vmem:[#allocation6 + $0xb0] sm:$0xff]  }
  0x3e   :  { %582 = vmatprep.subr.bf16.mxu0 %v739_v0  ;;  %v651_v48 = vld [vmem:[#allocation6 + $0xb8] sm:$0xff]   ;;  %v61_v58 = vld [vmem:[%s877_s4] sm:$0x3] }
  0x3f   :  { %v524_v60 = vadd.f32 -1.0, %v61_v58  ;;  %v455_v63 = vrot.slane %v61_v58, %v837_v18  ;;  %v477_v16 = vrot.slane %v61_v58, %v140_v36 }
  0x40   :  { %565 = vmatpush3.bf16.msra.mxu1 %v630_v6 }
  0x41   :  { %566 = vmatprep.subr.bf16.mxu1 %v739_v0  ;;  %583 = vmatpush3.bf16.msra.mxu0 %v637_v13  ;;  %v458_v62 = vmul.f32 1e+30, %v524_v60  ;;  %v480_v13 = vsub.f32 1.0, %v61_v58 }
  0x42   :  { %584 = vmatprep.subr.bf16.mxu0 %v739_v0 }
  0x43   :  { %v462_v3 = vrot.slane %v458_v62, %v837_v18 }
  0x44   :  { %567 = vmatpush3.bf16.msra.mxu1 %v631_v7 }
  0x45   :  { %568 = vmatprep.subr.bf16.mxu1 %v739_v0  ;;  %585 = vmatpush3.bf16.msra.mxu0 %v638_v14  ;;  %v482_v14 = vrot.slane %v61_v58, 1 }
  0x46   :  { %586 = vmatprep.subr.bf16.mxu0 %v739_v0 }
  0x48   :  { %569 = vmatpush3.bf16.msra.mxu1 %v632_v8 }
  0x49   :  { %570 = vmatprep.subr.bf16.mxu1 %v739_v0  ;;  %587 = vmatpush3.bf16.msra.mxu0 %v639_v15  ;;  %v484_v15 = vsub.f32 %v480_v13, %v482_v14 }
  0x4a   :  { %588 = vmatprep.subr.bf16.mxu0 %v739_v0 }
  0x4b   :  { %v488_v19 = vrot.slane %v484_v15, %v837_v18 }
  0x4c   :  { %571 = vmatpush3.bf16.msra.mxu1 %v633_v9 }
  0x4d   :  { %572 = vmatprep.subr.bf16.mxu1 %v739_v0  ;;  %589 = vmatpush3.bf16.msra.mxu0 %v640_v28 }
  0x4e   :  { %590 = vmatprep.subr.bf16.mxu0 %v739_v0 }
  0x50   :  { %573 = vmatpush3.bf16.msra.mxu1 %v634_v10 }
  0x51   :  { %574 = vmatprep.subr.bf16.mxu1 %v739_v0  ;;  %591 = vmatpush3.bf16.msra.mxu0 %v641_v29 }
  0x52   :  { %592 = vmatprep.subr.bf16.mxu0 %v739_v0 }
  0x54   :  { %575 = vmatpush3.bf16.msra.mxu1 %v635_v11 }
  0x55   :  { %600 = vmatprep.subr.bf16.mxu1 %v739_v0  ;;  %593 = vmatpush3.bf16.msra.mxu0 %v642_v30 }
  0x56   :  { %594 = vmatprep.subr.bf16.mxu0 %v739_v0 }
  0x59   :  { %595 = vmatpush3.bf16.msra.mxu0 %v643_v31 }
 0x10e   :  { %v114_v21 = vpop.f32.mrb[0].mxu0 }
 0x10f   :  { %v115_v22 = vadd.f32 %v114_v21, %v69_v20  ;;  %v558_v23 = vpop.f32.mrb[1].mxu0 }
 0x110   :  { %v117_v24 = vpop.f32.mrb[2].mxu0 }
 0x111   :  { %652 = vtanh.f32 %v115_v22  ;;  %v559_v25 = vpop.f32.mrb[3].mxu0 }
 0x11b   :  { %v653_v26 = vpop.eup %652 }
 0x11c   :  { %v121_v27 = vpack.c.bf16 %v653_v26, %v653_v26 }
 0x11e   :  { %577 = vmatmul.mubr.bf16.vlgmr.msra.gmra.mrb[0].mxu1 %v121_v27 }
 0x11f   :  { %616 = vmatprep.mubr.msk.bf16.mxu1 %vm740_vm0, %v739_v0  ;;  %601 = vmatpush3.bf16.msra.mxu1 %v644_v32 }
 0x120   :  { %602 = vmatprep.subr.bf16.mxu1 %v739_v0 }
 0x123   :  { %603 = vmatpush3.bf16.msra.mxu1 %v645_v33 }
 0x124   :  { %604 = vmatprep.subr.bf16.mxu1 %v739_v0 }
 0x127   :  { %605 = vmatpush3.bf16.msra.mxu1 %v646_v34 }
 0x128   :  { %606 = vmatprep.subr.bf16.mxu1 %v739_v0 }
 0x12b   :  { %607 = vmatpush3.bf16.msra.mxu1 %v647_v35 }
 0x12c   :  { %608 = vmatprep.subr.bf16.mxu1 %v739_v0 }
 0x12f   :  { %609 = vmatpush3.bf16.msra.mxu1 %v648_v45 }
 0x130   :  { %610 = vmatprep.subr.bf16.mxu1 %v739_v0 }
 0x133   :  { %611 = vmatpush3.bf16.msra.mxu1 %v649_v46 }
 0x134   :  { %612 = vmatprep.subr.bf16.mxu1 %v739_v0 }
 0x137   :  { %613 = vmatpush3.bf16.msra.mxu1 %v650_v47 }
 0x138   :  { %614 = vmatprep.subr.bf16.mxu1 %v739_v0 }
 0x13b   :  { %615 = vmatpush3.bf16.msra.mxu1 %v651_v48 }
 0x1f1   :  { %v224_v38 = vpop.f32.mrb[0].mxu1 }
 0x1f2   :  { %v225_v39 = vadd.f32 %v224_v38, %v141_v37  ;;  %v578_v40 = vpop.f32.mrb[1].mxu1 }
 0x1f3   :  { %v227_v41 = vpop.f32.mrb[2].mxu1 }
 0x1f4   :  { %654 = vtanh.f32 %v225_v39  ;;  %v579_v42 = vpop.f32.mrb[3].mxu1 }
 0x1fe   :  { %v655_v43 = vpop.eup %654 }
 0x1ff   :  { %v231_v44 = vpack.c.bf16 %v655_v43, %v655_v43 }
 0x201   :  { %597 = vmatmul.mubr.bf16.vlgmr.msra.gmra.mrb[4].mxu0 %v231_v44 }
 0x2d4   :  { %v335_v51 = vpop.f32.mrb[4].mxu0 }
 0x2d5   :  { %v336_v52 = vadd.f32 %v335_v51, %v252_v50  ;;  %v598_v53 = vpop.f32.mrb[5].mxu0 }
 0x2d6   :  { %v338_v54 = vpop.f32.mrb[6].mxu0 }
 0x2d7   :  { %656 = vtanh.f32 %v336_v52  ;;  %v599_v55 = vpop.f32.mrb[7].mxu0 }
 0x2e1   :  { %v657_v56 = vpop.eup %656 }
 0x2e2   :  { %v342_v57 = vpack.c.bf16 %v657_v56, %v657_v56 }
 0x2e4   :  { %617 = vmatmul.mubr.bf16.vlgmr.msra.gmra.mrb[4].mxu1 %v342_v57 }
 0x3b7   :  { %v446_v0 = vpop.f32.mrb[4].mxu1 }
 0x3b8   :  { %v447_v1 = vadd.f32 %v446_v0, %v363_v61  ;;  %v618_v2 = vpop.f32.mrb[5].mxu1 }
 0x3b9   :  { %v449_v4 = vpop.f32.mrb[6].mxu1 }
 0x3ba   :  { %v619_v5 = vpop.f32.mrb[7].mxu1  ;;  %v456_v6 = vmul.f32 %v455_v63, %v447_v1  ;;  %v489_v23 = vmul.f32 %v488_v19, %v447_v1 }
 0x3bc   :  { %v463_v7 = vadd.f32 %v462_v3, %v456_v6 }
 0x3be   :  { %464 = vmax.xlane.f32.xlu0 %v463_v7 }
 0x44b   :  { %v465_v8 = vpop.xlane.xlu0 %464 }
 0x44c   :  { %v466_v9 = vsub.f32 %v463_v7, %v465_v8 }
 0x44e   :  { %v467_v10 = vmul.f32 1.442695, %v466_v9 }
 0x450   :  { %658 = vpow2.f32 %v467_v10 }
 0x451   :  { %660 = vtanh.f32 %v447_v1 }
 0x45a   :  { %v659_v11 = vpop.eup %658 }
 0x45b   :  { %469 = vadd.xlane.f32.xlu0 %v659_v11  ;;  %v661_v17 = vpop.eup %660 }
 0x45c   :  { %v478_v21 = vmul.f32 %v661_v17, %v477_v16 }
 0x4e8   :  { %v470_v12 = vpop.xlane.xlu0 %469 }
 0x4e9   :  { %662 = vrcp.f32 %v470_v12 }
 0x4f3   :  { %v663_v20 = vpop.eup %662 }
 0x4f4   :  { %v472_v22 = vmul.f32 %v663_v20, %v659_v11 }
 0x4f6   :  { %v479_v24 = vadd.f32 %v478_v21, %v472_v22 }
 0x4f8   :  { %v490_v25 = vadd.f32 %v489_v23, %v479_v24 }
 0x4fa   :  { %491 = vst [vmem:[%s878_s5] sm:$0xff] %v490_v25 }
 0x4fb   :  { %496 = vsyncpa [#allocation3], 1 }
 0x4fc   :  { %497 = vsyncpa [#allocation5], 1 }

</bundles_post_ra>
